<compile_context>
chip_gen: v6e
topology: v6e:2x2x1
jax: 0.10.0
libtpu: 0.0.40
codegen_flags: <defaults>
</compile_context>

<pallas_src>
import functools

import numpy as np
import jax
import jax.numpy as jnp
from jax.experimental import pallas as pl
from jax.experimental.pallas import tpu as pltpu


def _round_up(x, m):
    return ((x + m - 1) // m) * m


def _vmem_capacity_bytes(default=64 * 1024 * 1024):
    """Per-TensorCore VMEM capacity; conservative fallback if query fails."""
    try:
        info = pltpu.get_tpu_info()
        cap = getattr(info, "vmem_capacity_bytes", None)
        if cap:
            return int(cap)
    except Exception:
        pass
    return default


def skip_gram_kernel(x_ref, bkpt_ref, o_ref, *, v_valid, exp_dtype):
    """logits = x_tile @ bkp_T (pre-transposed table), row softmax.

    x_ref   : (TB, D_pad)     tile of gathered input embeddings (bf16)
    bkpt_ref: (D_pad, V_pad)  resident, pre-transposed output-side table (bf16)
    o_ref   : (TB, V_pad)     softmax probabilities (bf16 by default)
    """
    # MXU matmul in natural (M,K)x(K,N) layout, f32 accumulation.
    logits = jnp.dot(x_ref[...], bkpt_ref[...],
                     preferred_element_type=jnp.float32)      # (TB, V_pad) f32

    v_pad = logits.shape[-1]

    # Stable softmax. Padded columns of `logits` are exactly 0 (zero-padded
    # operands), so m = max(valid_max, 0) is still a valid upper bound.
    m = jnp.max(logits, axis=-1, keepdims=True)               # (TB, 1) f32

    # exp in bf16 (EUP bf16 rate on v6e/v7x); accumulate the sum in f32.
    e = jnp.exp((logits - m).astype(exp_dtype))               # (TB, V_pad)
    denom = jnp.sum(e, axis=-1, keepdims=True, dtype=jnp.float32)

    if v_pad != v_valid:
        # Padded columns each contributed exp(bf16(-m)); subtract them with the
        # *same* dtype path so the cancellation is (bit-)exact. No per-element
        # mask over the (TB, V_pad) slab is needed.
        # NOTE: if ALL valid logits were < ~-87, exp underflows because m was
        # clamped to >= 0 by the zero padding -- pathological for embeddings.
        pad_e = jnp.exp((-m).astype(exp_dtype)).astype(jnp.float32)
        denom = denom - jnp.float32(v_pad - v_valid) * pad_e

    inv = pl.reciprocal(denom, approx=True).astype(o_ref.dtype)   # EUP slot
    o_ref[...] = e.astype(o_ref.dtype) * inv


def skip_gram_forward(x_idx, word_embs, bkp_word_embs, vocabs=None, *,
                      tb=None, compute_dtype=jnp.bfloat16,
                      out_dtype=jnp.bfloat16, exp_dtype=None):
    """JAX/Pallas equivalent of Skip_Gram.forward.

    out_dtype defaults to bf16 (kernel is HBM-writeback bound for typical D);
    pass out_dtype=jnp.float32 if downstream needs it, at ~2x output traffic.
    """
    if exp_dtype is None:
        exp_dtype = compute_dtype
    _, D = word_embs.shape

    # Output-side table: bkp_word_embs(self.vocabs). Skip the gather when
    # vocabs is a concrete identity permutation (avoids copying V*D through
    # HBM just to read it back). Falls back to a real gather under tracing.
    bkp = bkp_word_embs
    if vocabs is not None:
        skip_gather = False
        try:
            v_np = np.asarray(vocabs)
            skip_gather = (v_np.ndim == 1
                           and v_np.shape[0] == bkp_word_embs.shape[0]
                           and np.array_equal(
                               v_np, np.arange(bkp_word_embs.shape[0])))
        except Exception:
            skip_gather = False
        if not skip_gather:
            bkp = jnp.take(bkp_word_embs, vocabs, axis=0)
    V = bkp.shape[0]

    # Input-side gather: word_embs(x) — cheap glue, stays in plain JAX.
    # TODO(synk): fold this row gather into the kernel (scalar-prefetch ids +
    # per-row make_async_copy into a double-buffered (tb, D_pad) scratch).
    x_emb = jnp.take(word_embs, x_idx, axis=0)                 # (B, D)
    B = x_emb.shape[0]

    # bf16 inputs: full MXU rate, half the HBM/VMEM bytes; f32 accumulation.
    x_emb = x_emb.astype(compute_dtype)
    # Pre-transpose the table ONCE in the wrapper -> kernel matmul is plain
    # (M,K)x(K,N); no chance of a per-step XLU transpose of the table.
    bkp_t = bkp.astype(compute_dtype).T                        # (D, V)

    # Lane-dense padding: D, V -> multiples of 128 (unmasked vst, full MXU).
    D_pad = _round_up(D, 128)
    V_pad = _round_up(max(V, 8), 128)

    in_item = jnp.dtype(compute_dtype).itemsize
    out_item = jnp.dtype(out_dtype).itemsize

    # --- VMEM budget (per generation) -------------------------------------
    vmem_cap = _vmem_capacity_bytes()                  # 128 MiB v5e/v6e, 64 MiB v7x
    budget = max(vmem_cap - 8 * 1024 * 1024, 16 * 1024 * 1024)

    table_bytes = 2 * D_pad * V_pad * in_item          # auto-pipeline holds 2 copies
    # TODO(synk): single-buffer the constant-index table (pl.Buffered(1) /
    # manual DMA into scratch) to halve this term once megacore-safe.

    def _tile_bytes(t):
        return (table_bytes
                + 2 * t * D_pad * in_item              # double-buffered x tiles
                + 2 * t * V_pad * out_item             # double-buffered out tiles
                + 2 * t * V_pad * 4)                   # in-kernel f32 logits/exp temps

    if tb is None:
        tb = 8
        for cand in (512, 384, 256, 192, 128, 96, 64, 32, 16, 8):
            if _tile_bytes(cand) <= budget:
                tb = cand
                break
        # TODO(synk): if even tb=8 overflows (huge V*D, esp. v7x 64 MiB), add
        # a vocab tile axis (grid=(B//tb, V//tv), 'arbitrary') + online softmax.
    tb = max(8, _round_up(tb, 8))
    tb = min(tb, _round_up(B, 8))
    # Guarantee >= 2 grid steps so ("parallel",) actually shards the batch
    # axis across v7x's 2 TensorCores (no effect on v5e/v6e).
    if B >= 16 and tb >= B:
        tb = max(8, _round_up((B + 1) // 2, 8))

    B_pad = _round_up(B, tb)

    x_emb = jnp.pad(x_emb, ((0, B_pad - B), (0, D_pad - D)))
    bkp_t = jnp.pad(bkp_t, ((0, D_pad - D), (0, V_pad - V)))

    needed = _tile_bytes(tb)
    vmem_limit = int(min(max(needed + (4 << 20), 32 << 20),
                         vmem_cap - (4 << 20)))

    cost = pl.CostEstimate(
        flops=2 * B_pad * V_pad * D_pad,
        transcendentals=B_pad * V_pad,
        bytes_accessed=(B_pad * D_pad * in_item          # x tiles
                        + D_pad * V_pad * in_item        # resident table
                        + B_pad * V_pad * out_item),     # output
    )

    out = pl.pallas_call(
        functools.partial(skip_gram_kernel, v_valid=V, exp_dtype=exp_dtype),
        out_shape=jax.ShapeDtypeStruct((B_pad, V_pad), out_dtype),
        grid_spec=pltpu.PrefetchScalarGridSpec(
            num_scalar_prefetch=0,
            grid=(B_pad // tb,),
            in_specs=[
                pl.BlockSpec((tb, D_pad), lambda i: (i, 0)),      # x batch tile
                pl.BlockSpec((D_pad, V_pad), lambda i: (0, 0)),   # resident table
            ],
            out_specs=pl.BlockSpec((tb, V_pad), lambda i: (i, 0)),
        ),
        compiler_params=pltpu.CompilerParams(
            dimension_semantics=("parallel",),
            vmem_limit_bytes=vmem_limit,
        ),
        cost_estimate=cost,
    )(x_emb, bkp_t)

    # Only pay for the slice copy when padding actually exists; padded vocab
    # columns carry garbage (denominator-correction scheme) and MUST be cut.
    if B_pad != B or V_pad != V:
        out = out[:B, :V]
    return out


def reference_forward_f32(x_idx, word_embs, bkp_word_embs, vocabs):
    x_emb = word_embs[x_idx]
    bkp = bkp_word_embs[vocabs]
    return jax.nn.softmax(x_emb @ bkp.T, axis=-1)


if __name__ == "__main__":
    # Small, deterministic synthetic setup consistent with the module:
    #   vocabs -> vocab ids (length V), vector_size -> D, x -> B token indices
    V = 16        # vocab_numbers = len(vocabs)
    D = 32        # vector_size
    B = 16        # number of input tokens

    key = jax.random.PRNGKey(0)
    k_we, k_bkp, k_x = jax.random.split(key, 3)

    # nn.Embedding default init: weights ~ N(0, 1)
    word_embs = jax.random.normal(k_we, (V, D), dtype=jnp.float32)
    bkp_word_embs = jax.random.normal(k_bkp, (V, D), dtype=jnp.float32)
    vocabs = jnp.arange(V, dtype=jnp.int32)               # self.vocabs
    x = jax.random.randint(k_x, (B,), 0, V, dtype=jnp.int32)

    y = skip_gram_forward(x, word_embs, bkp_word_embs, vocabs)
    y = jax.block_until_ready(y)
    assert y.shape == (B, V)
    y32 = y.astype(jnp.float32)

    # Reference at the kernel's compute precision (bf16 inputs)
    x_bf = word_embs[x].astype(jnp.bfloat16).astype(jnp.float32)
    bkp_bf = bkp_word_embs[vocabs].astype(jnp.bfloat16).astype(jnp.float32)
    y_ref_bf = jax.nn.softmax(x_bf @ bkp_bf.T, axis=-1)
    assert jnp.allclose(y32, y_ref_bf, atol=2e-2, rtol=2e-2)

    # Full-f32 module semantics (looser: bf16 inputs/exp/out + approx recip)
    y_ref_f32 = reference_forward_f32(x, word_embs, bkp_word_embs, vocabs)
    assert jnp.allclose(y32, y_ref_f32, atol=5e-2, rtol=5e-2)

    # Rows still sum to 1 (within bf16 / approx-reciprocal rounding)
    assert jnp.allclose(jnp.sum(y32, axis=-1), 1.0, atol=2e-2)

    print("KERNEL_OK")
</pallas_src>

<mosaic_0001>
module attributes {stable_mosaic.version = 11 : i64} {
  func.func @skip_gram_kernel(%arg0: i32, %arg1: memref<8x128xbf16, #tpu.memory_space<vmem>>, %arg2: memref<128x128xbf16, #tpu.memory_space<vmem>>, %arg3: memref<8x128xbf16, #tpu.memory_space<vmem>>) attributes {dimension_semantics = [#tpu.dimension_semantics<parallel>], iteration_bounds = array<i64: 2>, scalar_prefetch = 0 : i64, scratch_operands = 0 : i64, tpu.core_type = #tpu.core_type<tc>, window_params = [{transform_indices = @transform_0, window_bounds = array<i64: 8, 128>}, {pipeline_mode = #tpu.pipeline_mode<synchronous>, transform_indices = @transform_1, window_bounds = array<i64: 128, 128>}, {transform_indices = @transform_2, window_bounds = array<i64: 8, 128>}]} {
    %c0 = arith.constant 0 : index
    %c0_0 = arith.constant 0 : index
    %0 = vector.load %arg1[%c0, %c0_0] : memref<8x128xbf16, #tpu.memory_space<vmem>>, vector<8x128xbf16>
    %c0_1 = arith.constant 0 : index
    %c0_2 = arith.constant 0 : index
    %1 = vector.load %arg2[%c0_1, %c0_2] : memref<128x128xbf16, #tpu.memory_space<vmem>>, vector<128x128xbf16>
    %cst = arith.constant dense<0.000000e+00> : vector<8x128xf32>
    %2 = tpu.matmul %0, %1, %cst {dimension_numbers = #tpu.dot_dimension_numbers<[1], [0], [0], [1], [0, 0, 1, 1], [], []>} : vector<8x128xbf16>, vector<128x128xbf16>, vector<8x128xf32> -> vector<8x128xf32>
    %cst_3 = arith.constant dense<0xFF800000> : vector<8xf32>
    %3 = vector.multi_reduction <maximumf>, %2, %cst_3 [1] : vector<8x128xf32> to vector<8xf32>
    %4 = vector.shape_cast %3 : vector<8xf32> to vector<8x1xf32>
    %5 = vector.broadcast %4 : vector<8x1xf32> to vector<8x128xf32>
    %6 = arith.subf %2, %5 : vector<8x128xf32>
    %7 = arith.truncf %6 : vector<8x128xf32> to vector<8x128xbf16>
    %8 = math.exp %7 : vector<8x128xbf16>
    %9 = arith.extf %8 : vector<8x128xbf16> to vector<8x128xf32>
    %cst_4 = arith.constant dense<0.000000e+00> : vector<8xf32>
    %10 = vector.multi_reduction <add>, %9, %cst_4 [1] : vector<8x128xf32> to vector<8xf32>
    %11 = vector.shape_cast %10 : vector<8xf32> to vector<8x1xf32>
    %cst_5 = arith.constant 0.000000e+00 : f32
    %12 = vector.broadcast %cst_5 : f32 to vector<8x1xf32>
    %13 = arith.subf %12, %4 : vector<8x1xf32>
    %14 = arith.truncf %13 : vector<8x1xf32> to vector<8x1xbf16>
    %15 = math.exp %14 : vector<8x1xbf16>
    %16 = arith.extf %15 : vector<8x1xbf16> to vector<8x1xf32>
    %cst_6 = arith.constant 1.120000e+02 : f32
    %17 = vector.broadcast %cst_6 : f32 to vector<8x1xf32>
    %18 = arith.mulf %17, %16 : vector<8x1xf32>
    %19 = arith.subf %11, %18 : vector<8x1xf32>
    %20 = tpu.reciprocal %19 {approx = true} : vector<8x1xf32> -> vector<8x1xf32>
    %21 = arith.truncf %20 : vector<8x1xf32> to vector<8x1xbf16>
    %22 = vector.broadcast %21 : vector<8x1xbf16> to vector<8x128xbf16>
    %23 = arith.mulf %8, %22 : vector<8x128xbf16>
    %c0_7 = arith.constant 0 : index
    %c0_8 = arith.constant 0 : index
    %24 = vector.load %arg3[%c0_7, %c0_8] : memref<8x128xbf16, #tpu.memory_space<vmem>>, vector<8x128xbf16>
    tpu.vector_store %arg3[%c0_7, %c0_8], %23 {strides = array<i32>} : memref<8x128xbf16, #tpu.memory_space<vmem>>, vector<8x128xbf16>,
    return
  }
  func.func @transform_0(%arg0: i32) -> (i32, i32) {
    %c0_i32 = arith.constant 0 : i32
    %c0_i32_0 = arith.constant 0 : i32
    return %arg0, %c0_i32 : i32, i32
  }
  func.func @transform_1(%arg0: i32) -> (i32, i32) {
    %c0_i32 = arith.constant 0 : i32
    %c0_i32_0 = arith.constant 0 : i32
    %c0_i32_1 = arith.constant 0 : i32
    return %c0_i32, %c0_i32_0 : i32, i32
  }
  func.func @transform_2(%arg0: i32) -> (i32, i32) {
    %c0_i32 = arith.constant 0 : i32
    %c0_i32_0 = arith.constant 0 : i32
    return %arg0, %c0_i32 : i32, i32
  }
}

</mosaic_0001>

<bundles_post_ra>
// kernel: tpu_custom_call.1
= control target key start
LH: loop header
LB: loop body
LE: loop exit
PB: predicated region body
PF: predicated region fallthrough
CT: control target
= control target key end

     0   :  { %7 = vsyncpa [#allocation3], 0  ;;  %s829_s0 = inlined_call_operand.hbm [shape: bf16[16,128], index: 0, kind: input, shape index: {}]   ;;  %s830_s1 = inlined_call_operand.hbm [shape: bf16[128,128], index: 1, kind: input, shape index: {}]   ;;  %s831_s2 = inlined_call_operand.hbm [shape: bf16[16,128], index: 2, kind: output, shape index: {}]  }
   0x1   :  { %9 = vsyncpa [#allocation3 + $0x1], 0 }
   0x2   :  { %10 = vsyncpa [#allocation6], 0 }
   0x3   :  { %11 = vsyncpa [#allocation4], 0 }
   0x4   :  { %13 = vsyncpa [#allocation4 + $0x1], 0  ;;  %s668_s9 = smov 0   ;;  %s670_s10 = smov 0  }
   0x5   :  { %s672_s11 = smov 0   ;;  %s674_s12 = smov 0  }
   0x6 LB: > { %s689_s13 = sadd.s32 4294967295, %s644_s12   ;;  %s396_s14 = sadd.s32 4294967294, %s644_s12   ;;  %s644_s12 = sphi %s674_s12, %s853_s12   ;;  %s640_s11 = sphi %s672_s11, %s852_s11   ;;  %s636_s10 = sphi %s670_s10, %s851_s10   ;;  %s632_s9 = sphi %s668_s9, %s850_s9  }
   0x7   : > { %p39_p0 = scmp.ne.s32.totalorder %s636_s10, %s632_s9  ;;  %p832_p1 = scmp.eq.s32.totalorder %s689_s13, 0 }
   0x8   : > { %p90_p3 = scmp.eq.s32.totalorder %s396_s14, 1  ;;  %p397_p5 = scmp.ge.s32.totalorder %s644_s12, 1 }
   0x9   : > { %p698_p4 = por %p832_p1, %p39_p0  ;;  %p97_p7 = scmp.lt.s32.totalorder %s644_s12, 3 }
   0xa   : > { %p703_p6 = por %p90_p3, %p39_p0  ;;  %s646_s18 = smov [#allocation5]  }
   0xb   : > { %s836_s15 = scalar_select %p698_p4, 1, 0 }
   0xc   : > { %s837_s16 = scalar_select %p703_p6, 1, 0 }
   0xd   : > { %p708_p8 = pnand %p397_p5, %p97_p7  ;;  %s109_s19 = sshll.u32 %s646_s18, 4  ;;  %s110_s19 = int_to_ptr.vmem [resolvable:$true] %s109_s19 }
   0xe   : > { %s722_s21 = sadd.s32 1, %s644_s12   ;;  %s26_s22 = sadd.s32 1, %s640_s11 }
   0xf   : > { %s838_s17 = scalar_select %p708_p8, 1, 0 }
  0x10   : > { %p455_p9 = pneg %p708_p8  ;;  %s23_s23 = ssub.s32 %s644_s12, %s722_s21 }
  0x11   : > { %s533_s24 = scalar_lea.vmem %s110_s19, 1024  ;;  %p541_p5 = scmp.lt.s32.totalorder %s110_s19, %s110_s19 }
  0x12   : > { %p717_p11 = pnand %p455_p9, %p832_p1  ;;  %p534_p13 = scmp.ne.s32.totalorder %s110_s19, %s533_s24 }
  0x13   : > { %p542_p7 = scmp.lt.s32.totalorder %s533_s24, %s533_s24 }
  0x14   : > { %p524_p12 = pneg %p717_p11 }
  0x15   : > { %p543_p10 = por %p542_p7, %p541_p5 }
  0x16   : > { %p536_p0 = pnand %p534_p13, %p524_p12 }
  0x18   : > { %p537_p3 = pneg %p536_p0 }
  0x1a   : > { %p544_p2 = pnand %p543_p10, %p537_p3 }
  0x1c   : > { %547 = shalt.err (!%p544_p2)
}
  0x1d   : > { %s647_s25 = smov 64   ;;  %s648_s26 = smov 4  }
  0x1e   : > { %458 = dma.hbm_to_vmem [thread:$0]  (!%p717_p11), %s830_s1, 1024, %s110_s19, [#allocation6], %s647_s25, %s647_s25, %s648_s26  }
  0x1f   : > { %p24_p9 = scmp.eq.s32.totalorder %s23_s23, 0  ;;  %p33_p12 = scmp.ne.s32.totalorder %s640_s11, %s636_s10 }
  0x20   : > { %p34_p10 = scmp.eq.s32.totalorder %s644_s12, 0  ;;  %p468_p2 = scmp.lt.s32.totalorder %s644_s12, 2 }
  0x21   : > { %s739_s29 = scalar_select %p24_p9, %s640_s11, %s26_s22  }
  0x22   : > { %p35_p13 = por %p34_p10, %p33_p12  ;;  %p840_p0 = scmp.eq.s32.totalorder %s689_s13, 1 }
  0x23   : > { %s123_s3 = sand.u32 1, %s640_s11   ;;  %s401_s4 = sshll.u32 %s644_s12, 6 }
  0x24   : > { %p743_p3 = por %p840_p0, %p33_p12  ;;  %s400_s5 = sshll.u32 %s123_s3, 2 }
  0x25   : > { %s752_s8 = scalar_lea.hbm %s829_s0, %s401_s4  ;;  %s127_s14 = scalar_lea.vmem [#allocation2], %s400_s5 }
  0x26   : > { %s841_s30 = scalar_select %p743_p3, 1, 0 }
  0x27   : > { %s134_s18 = sshll.u32 %s127_s14, 4  ;;  %p754_p11 = pnand %p468_p2, %p35_p13  ;;  %s135_s18 = int_to_ptr.vmem [resolvable:$true] %s134_s18 }
  0x28   : > { %s124_s20 = scalar_lea.sflag [#allocation3], %s123_s3  ;;  %s548_s22 = scalar_lea.hbm %s752_s8, 64 }
  0x29   : > { %p549_p5 = scmp.ne.s32.totalorder %s752_s8, %s548_s22  ;;  %p550_p7 = pneg %p754_p11 }
  0x2a   : > { %s553_s25 = scalar_lea.hbm %s829_s0, 128  ;;  %p554_p10 = scmp.lt.s32.totalorder %s752_s8, %s829_s0 }
  0x2b   : > { %p551_p9 = pnand %p550_p7, %p549_p5  ;;  %p555_p2 = scmp.lt.s32.totalorder %s553_s25, %s548_s22 }
  0x2d   : > { %p552_p12 = pneg %p551_p9  ;;  %p556_p13 = por %p555_p2, %p554_p10 }
  0x2f   : > { %p557_p0 = pnand %p556_p13, %p552_p12 }
  0x31   : > { %560 = shalt.err (!%p557_p0)
}
  0x32   : > { %s561_s28 = scalar_lea.vmem %s135_s18, 64  ;;  %s649_s3 = smov [#allocation2]  }
  0x33   : > { %p562_p1 = scmp.ne.s32.totalorder %s135_s18, %s561_s28  ;;  %s566_s4 = sshll.u32 %s649_s3, 4  ;;  %s567_s4 = int_to_ptr.vmem [resolvable:$false] %s566_s4 }
  0x34   : > { %s568_s5 = scalar_lea.vmem %s567_s4, 128  ;;  %p569_p5 = scmp.lt.s32.totalorder %s135_s18, %s567_s4 }
  0x35   : > { %p564_p6 = pnand %p562_p1, %p550_p7  ;;  %p570_p9 = scmp.lt.s32.totalorder %s568_s5, %s561_s28 }
  0x37   : > { %p565_p3 = pneg %p564_p6  ;;  %p571_p4 = por %p570_p9, %p569_p5 }
  0x39   : > { %p572_p8 = pnand %p571_p4, %p565_p3 }
  0x3b   : > { %575 = shalt.err (!%p572_p8)
}
  0x3c   : > { %462 = dma.hbm_to_vmem [thread:$0]  (!%p754_p11), %s752_s8, 64, %s135_s18, %s124_s20  }
  0x3d   : > { %p843_p12 = scmp.ne.s32.totalorder %s838_s17, 0 }
  0x3e   : > { %s775_s6 = sand.u32 (!%p843_p12), 1, %s636_s10   ;;  %p844_p1 = scmp.ne.s32.totalorder (!%p843_p12), %s836_s15, 0 }
  0x3f   : > { %143 = sbr.rel (%p843_p12) target bundleno = 630 (0x276), region = 28  ;;  %s403_s7 = sshll.u32 (!%p843_p12), %s775_s6, 2 }
  0x40   : > { %s146_s14 = scalar_lea.sflag (!%p843_p12), [#allocation3], %s775_s6  ;;  %s781_s22 = scalar_lea.vmem (!%p843_p12), [#allocation2], %s403_s7 }
  0x44   : > { %619 = dma.done.wait (%p844_p1), %s146_s14, 64  }
  0x45   : > { %621 = vsyncadd (%p844_p1), %s146_s14, 4294967232  ;;  %p845_p4 = scmp.eq.s32.totalorder %s689_s13, 0 }
  0x47   : > { %623 = dma.done.wait (%p845_p4), [#allocation6], 1024   ;;  %p846_p6 = pmov %p845_p4 }
  0x48   : > { %v650_v0 = vmov 0.0   ;;  %vm651_vm0 = vmmov 0   ;;  %v508_v1 = vld [vmem:[#allocation5 + $0x38] sm:$0xff]   ;;  %v509_v2 = vld [vmem:[#allocation5 + $0x30] sm:$0xff]   ;;  %v510_v3 = vld [vmem:[#allocation5 + $0x28] sm:$0xff]   ;;  %s415_s15 = sshll.u32 %s689_s13, 6 }
  0x49   : > { %625 = vsyncadd (%p846_p6), [#allocation6], 4294966272  ;;  %427 = vmatprep.subr.bf16.mxu0 %v650_v0  ;;  %443 = vmatprep.mubr.msk.bf16.mxu0 %vm651_vm0, %v650_v0  ;;  %v511_v4 = vld [vmem:[#allocation5 + $0x20] sm:$0xff]   ;;  %v512_v5 = vld [vmem:[#allocation5 + $0x18] sm:$0xff]   ;;  %s173_s17 = scalar_lea.vmem [#allocation7], %s403_s7  ;;  %s314_s20 = scalar_lea.hbm %s831_s2, %s415_s15 }
  0x4a   : > { %428 = vmatpush3.bf16.msra.mxu0 %v508_v1  ;;  %v513_v6 = vld [vmem:[#allocation5 + $0x10] sm:$0xff]   ;;  %v514_v7 = vld [vmem:[#allocation5 + $0x8] sm:$0xff]   ;;  %v515_v8 = vld [vmem:[#allocation5] sm:$0xff]   ;;  %s316_s8 = sshll.u32 %s173_s17, 4  ;;  %s303_s23 = scalar_lea.sflag [#allocation4], %s775_s6  ;;  %s317_s8 = int_to_ptr.vmem [resolvable:$true] %s316_s8 }
  0x4b   : > { %429 = vmatprep.subr.bf16.mxu0 %v650_v0  ;;  %v175_v9 = vld [vmem:[%s781_s22] sm:$0xf]  ;;  %s576_s24 = scalar_lea.vmem %s317_s8, 64  ;;  %p847_p3 = scmp.ne.s32.totalorder %s841_s30, 0 }
  0x4c   : > { %p577_p8 = scmp.ne.s32.totalorder %s317_s8, %s576_s24  ;;  %s652_s25 = smov [#allocation7]  }
  0x4d   : > { %s580_s26 = sshll.u32 %s652_s25, 4  ;;  %s581_s26 = int_to_ptr.vmem [resolvable:$false] %s580_s26 }
  0x4e   : > { %430 = vmatpush3.bf16.msra.mxu0 %v509_v2  ;;  %p578_p11 = pnand %p577_p8, %p847_p3  ;;  %s582_s13 = scalar_lea.vmem %s581_s26, 128 }
  0x4f   : > { %431 = vmatprep.subr.bf16.mxu0 %v650_v0  ;;  %p583_p10 = scmp.lt.s32.totalorder %s317_s8, %s581_s26  ;;  %p584_p2 = scmp.lt.s32.totalorder %s582_s13, %s576_s24 }
  0x50   : > { %p579_p7 = pneg %p578_p11 }
  0x51   : > { %p585_p13 = por %p584_p2, %p583_p10 }
  0x52   : > { %432 = vmatpush3.bf16.msra.mxu0 %v510_v3 }
  0x53   : > { %433 = vmatprep.subr.bf16.mxu0 %v650_v0  ;;  %p586_p0 = pnand %p585_p13, %p579_p7 }
  0x56   : > { %434 = vmatpush3.bf16.msra.mxu0 %v511_v4 }
  0x57   : > { %435 = vmatprep.subr.bf16.mxu0 %v650_v0 }
  0x5a   : > { %436 = vmatpush3.bf16.msra.mxu0 %v512_v5 }
  0x5b   : > { %437 = vmatprep.subr.bf16.mxu0 %v650_v0 }
  0x5e   : > { %438 = vmatpush3.bf16.msra.mxu0 %v513_v6 }
  0x5f   : > { %439 = vmatprep.subr.bf16.mxu0 %v650_v0 }
  0x62   : > { %440 = vmatpush3.bf16.msra.mxu0 %v514_v7 }
  0x63   : > { %441 = vmatprep.subr.bf16.mxu0 %v650_v0 }
  0x66   : > { %442 = vmatpush3.bf16.msra.mxu0 %v515_v8 }
  0x69   : > { %444 = vmatmul.mubr.bf16.vlgmr.msra.gmra.mxu0 %v175_v9 }
 0x129   : > { %v274_v10 = vpop.f32.mrf.mxu0 }
 0x12a   : > { %280 = vmax.xlane.f32.xlu0 %v274_v10 }
 0x12b   : > { %v445_v11 = vpop.f32.mrf.mxu0 }
 0x12d   : > { %v277_v12 = vpop.f32.mrf.mxu0 }
 0x12f   : > { %v446_v13 = vpop.f32.mrf.mxu0 }
 0x1b3   : > { %v281_v14 = vpop.xlane.xlu0 %280 }
 0x1b4   : > { %v282_v15 = vsub.f32 %v274_v10, %v281_v14  ;;  %v290_v20 = vsub.f32 0.0, %v281_v14 }
 0x1b6   : > { %v283_v16 = vpack.c.bf16 %v282_v15, %v282_v15  ;;  %v291_v21 = vpack.c.bf16 %v290_v20, %v290_v20 }
 0x1b8   : > { %v285_v17 = vmul.bf16 1069105081, %v283_v16  ;;  %v293_v22 = vmul.bf16 1069105081, %v291_v21 }
 0x1ba   : > { %516 = vpow.bf16 %v285_v17 }
 0x1bb   : > { %518 = vpow.bf16 %v293_v22 }
 0x1c8   : > { %v517_v18 = vpop.eup %516 }
 0x1c9   : > { %v287_v19 = vunpack.c.l.bf16 %v517_v18  ;;  %v519_v23 = vpop.eup %518 }
 0x1ca   : > { %v295_v24 = vunpack.c.l.bf16 %v519_v23 }
 0x1cb   : > { %288 = vadd.xlane.f32.xlu0 %v287_v19 }
 0x1cc   : > { %v296_v25 = vmul.f32 112.0, %v295_v24 }
 0x254   : > { %v289_v26 = vpop.xlane.xlu0 %288 }
 0x255   : > { %v297_v27 = vsub.f32 %v289_v26, %v296_v25 }
 0x257   : > { %520 = vrcp.f32 %v297_v27 }
 0x264   : > { %v521_v28 = vpop.eup %520 }
 0x265   : > { %v299_v29 = vpack.c.bf16 %v521_v28, %v521_v28 }
 0x267   : > { %v300_v30 = vmul.bf16 %v517_v18, %v299_v29 }
 0x269   : > { %301 = vst [vmem:[%s173_s17] sm:$0xf] %v300_v30 }
 0x26a   : > { %589 = shalt.err (!%p586_p0)
}
 0x26b   : > { %s590_s27 = scalar_lea.hbm %s314_s20, 64  ;;  %s594_s4 = scalar_lea.hbm %s831_s2, 128 }
 0x26c   : > { %p591_p5 = scmp.ne.s32.totalorder %s314_s20, %s590_s27  ;;  %p595_p1 = scmp.lt.s32.totalorder %s314_s20, %s831_s2 }
 0x26d   : > { %p596_p4 = scmp.lt.s32.totalorder %s594_s4, %s590_s27 }
 0x26e   : > { %p592_p9 = pnand %p591_p5, %p847_p3 }
 0x26f   : > { %p597_p6 = por %p596_p4, %p595_p1 }
 0x270   : > { %p593_p12 = pneg %p592_p9 }
 0x272   : > { %p598_p8 = pnand %p597_p6, %p593_p12 }
 0x274   : > { %601 = shalt.err (!%p598_p8)
}
 0x275   : > { %453 = dma.vmem_to_hbm [thread:$0]  (%p847_p3), %s317_s8, 64, %s314_s20, %s303_s23  }
 0x276 PF: > { %s328_s7 = sand.u32 1, %s632_s9   ;;  %p848_p11 = scmp.ne.s32.totalorder %s837_s16, 0 }
 0x277   : > { %p849_p7 = scmp.ge.s32.totalorder %s644_s12, 2  ;;  %s329_s14 = scalar_lea.sflag [#allocation4], %s328_s7 }
 0x279   : > { %p464_p10 = pnand %p849_p7, %p848_p11 }
 0x27b   : > { %p465_p2 = pneg %p464_p10 }
 0x27d   : > { %627 = dma.done.wait (%p465_p2), %s329_s14, 64  }
 0x27e   : > { %629 = vsyncadd (%p465_p2), %s329_s14, 4294967232  ;;  %p16_p13 = scmp.ge.s32.totalorder %s722_s21, 4   ;;  %s850_s9 = smov %s636_s10 }
 0x27f   : > { %s851_s10 = smov %s640_s11  ;;  %s852_s11 = smov %s739_s29 }
 0x280   : > { %s853_s12 = smov %s722_s21  ;;  %18 = sbr.rel (!%p16_p13) target bundleno = 6 (0x6), region = 77 }
 0x285   :  { %334 = vsyncpa [#allocation3], 1 }
 0x286   :  { %336 = vsyncpa [#allocation3 + $0x1], 1 }
 0x287   :  { %337 = vsyncpa [#allocation6], 1 }
 0x288   :  { %338 = vsyncpa [#allocation4], 1 }
 0x289   :  { %340 = vsyncpa [#allocation4 + $0x1], 1 }

</bundles_post_ra>
